<compile_context>
chip_gen: v7x
topology: tpu7x:2x2x1
jax: 0.10.0
libtpu: 0.0.40
codegen_flags: <defaults>
</compile_context>

<pallas_src>
import functools

import jax
import jax.numpy as jnp
from jax import lax
from jax.experimental import pallas as pl
from jax.experimental.pallas import tpu as pltpu

F32 = jnp.float32
BATCH_TILE = 8   # one full sublane tile of batch rows per grid program


# ------------------------------ fused kernel ------------------------------- #

def _razonbill_kernel(x_ref,                      # (S, Bt, D)  time-major batch tile
                      wih_ref, whh_ref, bl_ref,   # (D, 4H), (H, 4H), (1, 4H)  i|f|g|o
                      cew_ref, ceb_ref,           # (H, D), (1, D)  folded ctx∘emotion
                      headw_ref, headb_ref,       # (D, D), (1, D)  introspection_head
                      out_ref,                    # (S, Bt, D)
                      xg_scr,                     # (S*Bt, 4H)  hoisted input projections
                      intro_scr,                  # (S*Bt, H)   LSTM outputs (introspection)
                      *, seq_len, batch_tile, hidden, unroll):
    S, Bt, H = seq_len, batch_tile, hidden
    D = x_ref.shape[2]

    # (1) Input projections for every (row, timestep), hoisted out of the serial
    #     recurrence: one (S*Bt, D) x (D, 4H) matmul; 4H is lane-dense (128 for D=32).
    #     (S, Bt, D) -> (S*Bt, D) is a no-op relayout because Bt == 8 sublanes.
    x_flat = x_ref[...].reshape(S * Bt, D)
    xg_scr[...] = (jnp.dot(x_flat, wih_ref[...], preferred_element_type=jnp.float32)
                   + bl_ref[...])

    whh = whh_ref[...]
    # Hoisted gate-selection lane mask: lanes [2H, 3H) are the cell gate g (tanh),
    # everything else (i, f, o) is sigmoid.  torch.nn.LSTM gate order i|f|g|o.
    lane = lax.broadcasted_iota(jnp.int32, (Bt, 4 * H), 1)
    is_g = (lane >= 2 * H) & (lane < 3 * H)

    # (2) Recurrence: one packed (Bt, H) x (H, 4H) matmul per step; h/c live in
    #     vregs via the loop carry (no VMEM traffic on the serial chain).
    def step(t, carry):
        h, c = carry
        row = pl.multiple_of(t * Bt, Bt)                       # aligned sublane slice
        gates = xg_scr[pl.ds(row, Bt), :] + jnp.dot(
            h, whh, preferred_element_type=jnp.float32)        # (Bt, 4H)
        act = jnp.where(is_g, jnp.tanh(gates), jax.nn.sigmoid(gates))
        i_g = act[:, 0 * H:1 * H]
        f_g = act[:, 1 * H:2 * H]
        g_g = act[:, 2 * H:3 * H]
        o_g = act[:, 3 * H:4 * H]
        c_new = f_g * c + i_g * g_g
        h_new = o_g * jnp.tanh(c_new)
        intro_scr[pl.ds(row, Bt), :] = h_new
        return h_new, c_new

    h0 = jnp.zeros((Bt, H), jnp.float32)
    c0 = jnp.zeros((Bt, H), jnp.float32)
    h_last, _ = lax.fori_loop(0, S, step, (h0, c0), unroll=unroll)

    # (3) Folded context_processor∘emotion_gate on the final hidden state, then SiLU.
    ce = jnp.dot(h_last, cew_ref[...], preferred_element_type=jnp.float32) + ceb_ref[...]
    emo = ce * jax.nn.sigmoid(ce)                              # (Bt, D)  SiLU, f32

    # (4) Gate the whole introspection sequence by the emotion signal (broadcast over
    #     time) and apply introspection_head as one (S*Bt, H) x (H, D) matmul.
    gated = (intro_scr[...].reshape(S, Bt, H) * emo[None, :, :]).reshape(S * Bt, H)
    y = jnp.dot(gated, headw_ref[...], preferred_element_type=jnp.float32) + headb_ref[...]
    # NOTE: D=32 < 128 lanes -> masked stores; only worth a lane-dense (Bt, S*D)
    # out_spec once B*S*D is non-trivial.
    out_ref[...] = y.reshape(S, Bt, D)


@jax.jit
def razonbill_forward(params, x):
    B, S, D = x.shape
    H = params["w_hh"].shape[0]
    # The reference broadcast `introspection * emotion_signal.unsqueeze(1)` requires
    # hidden_size == dim (the module's default: hidden_size=None -> dim).
    assert H == D, "RazonbillModule semantics require hidden_size == dim"

    Bt = BATCH_TILE
    Bp = ((B + Bt - 1) // Bt) * Bt          # pad batch to a multiple of the tile

    # Fold context_processor and emotion_gate (no nonlinearity between them).
    hi = lax.Precision.HIGHEST
    ce_w = jnp.dot(params["ctx_w"], params["emo_w"], precision=hi)                      # (H, D)
    ce_b = jnp.dot(params["ctx_b"], params["emo_w"], precision=hi) + params["emo_b"]    # (1, D)

    # Time-major layout so the kernel's per-step slice is a contiguous sublane block.
    x_tm = jnp.swapaxes(x, 0, 1)            # (S, B, D)
    if Bp != B:
        x_tm = jnp.pad(x_tm, ((0, 0), (0, Bp - B), (0, 0)))

    unroll = True if S <= 32 else 8
    kernel = functools.partial(_razonbill_kernel, seq_len=S, batch_tile=Bt,
                               hidden=H, unroll=unroll)

    def full(a):
        return pl.BlockSpec(a.shape, lambda b: (0, 0))

    out_tm = pl.pallas_call(
        kernel,
        out_shape=jax.ShapeDtypeStruct((S, Bp, D), F32),
        grid=(Bp // Bt,),
        in_specs=[
            pl.BlockSpec((S, Bt, D), lambda b: (0, b, 0)),     # x: 8 batch rows / program
            full(params["w_ih"]), full(params["w_hh"]), full(params["b_lstm"]),
            full(ce_w), full(ce_b),
            full(params["head_w"]), full(params["head_b"]),
        ],
        out_specs=pl.BlockSpec((S, Bt, D), lambda b: (0, b, 0)),
        scratch_shapes=[
            pltpu.VMEM((S * Bt, 4 * H), F32),   # hoisted input-gate projections
            pltpu.VMEM((S * Bt, H), F32),       # introspection (LSTM outputs)
        ],
        compiler_params=pltpu.CompilerParams(
            # Batch tiles are independent -> v7x's 2 TensorCores split them (B >= 16).
            dimension_semantics=("parallel",),
        ),
    )(x_tm, params["w_ih"], params["w_hh"], params["b_lstm"],
      ce_w, ce_b, params["head_w"], params["head_b"])

    return jnp.swapaxes(out_tm, 0, 1)[:B]   # (B, S, D), drop batch padding


# ------------------------------ parameters --------------------------------- #

def init_params(key, dim, hidden_size=None):
    """torch-style init; LSTM weights pre-packed/pre-transposed for x @ W layout."""
    D = dim
    H = hidden_size or dim
    ks = jax.random.split(key, 10)
    k_lstm = 1.0 / (H ** 0.5)
    k_ctx = 1.0 / (H ** 0.5)
    k_lin = 1.0 / (D ** 0.5)

    def u(k, shape, bound):
        return jax.random.uniform(k, shape, F32, -bound, bound)

    return dict(
        # nn.LSTM(dim, H): weight_ih/hh packed i|f|g|o, stored (in, 4H); b = b_ih+b_hh
        w_ih=u(ks[0], (D, 4 * H), k_lstm),
        w_hh=u(ks[1], (H, 4 * H), k_lstm),
        b_lstm=u(ks[2], (1, 4 * H), k_lstm) + u(ks[3], (1, 4 * H), k_lstm),
        # context_processor: Linear(H, D)
        ctx_w=u(ks[4], (H, D), k_ctx), ctx_b=u(ks[5], (1, D), k_ctx),
        # emotion_gate: Linear(D, D)
        emo_w=u(ks[6], (D, D), k_lin), emo_b=u(ks[7], (1, D), k_lin),
        # introspection_head: Linear(D, D)
        head_w=u(ks[8], (D, D), k_lin), head_b=u(ks[9], (1, D), k_lin),
    )


# --------------------------- pure-JAX reference ----------------------------- #

def reference_forward(params, x):
    B, S, D = x.shape
    H = params["w_hh"].shape[0]
    hi = lax.Precision.HIGHEST

    def step(carry, x_t):
        h, c = carry
        gates = (jnp.dot(x_t, params["w_ih"], precision=hi)
                 + jnp.dot(h, params["w_hh"], precision=hi) + params["b_lstm"])
        i = jax.nn.sigmoid(gates[:, 0 * H:1 * H])
        f = jax.nn.sigmoid(gates[:, 1 * H:2 * H])
        g = jnp.tanh(gates[:, 2 * H:3 * H])
        o = jax.nn.sigmoid(gates[:, 3 * H:4 * H])
        c = f * c + i * g
        h = o * jnp.tanh(c)
        return (h, c), h

    init = (jnp.zeros((B, H), F32), jnp.zeros((B, H), F32))
    (h_last, _), hs = lax.scan(step, init, jnp.swapaxes(x, 0, 1))
    introspection = jnp.swapaxes(hs, 0, 1)                                   # (B, S, H)
    ctx = jnp.dot(h_last, params["ctx_w"], precision=hi) + params["ctx_b"]   # (B, D)
    emo = jnp.dot(ctx, params["emo_w"], precision=hi) + params["emo_b"]
    emo = emo * jax.nn.sigmoid(emo)                                          # SiLU
    out = jnp.dot(introspection * emo[:, None, :], params["head_w"],
                  precision=hi) + params["head_b"]
    return out


# ---------------------------------- main ------------------------------------ #

if __name__ == "__main__":
    key = jax.random.PRNGKey(0)
    pkey, xkey, xkey2 = jax.random.split(key, 3)

    # Small case (batch=2, seq=8, dim=hidden=32): single batch tile, grid=(1,).
    B, S, D = 2, 8, 32
    params = init_params(pkey, D)
    x = jax.random.normal(xkey, (B, S, D), F32)
    out = razonbill_forward(params, x)
    jax.block_until_ready(out)
    ref = reference_forward(params, x)
    assert out.shape == (B, S, D)
    assert bool(jnp.allclose(out, ref, atol=5e-3, rtol=5e-3)), \
        f"mismatch vs reference: {float(jnp.max(jnp.abs(out - ref)))}"

    # Larger batch with padding (B=10 -> Bp=16): exercises 2 grid programs and the
    # pad/slice path (both v7x TensorCores would each take one 8-row tile).
    B2 = 10
    x2 = jax.random.normal(xkey2, (B2, S, D), F32)
    out2 = razonbill_forward(params, x2)
    jax.block_until_ready(out2)
    ref2 = reference_forward(params, x2)
    assert out2.shape == (B2, S, D)
    assert bool(jnp.allclose(out2, ref2, atol=5e-3, rtol=5e-3)), \
        f"mismatch vs reference (padded batch): {float(jnp.max(jnp.abs(out2 - ref2)))}"

    print("KERNEL_OK")
</pallas_src>

<mosaic_0001>
module attributes {stable_mosaic.version = 11 : i64} {
  func.func @_razonbill_kernel(%arg0: i32, %arg1: memref<8x8x32xf32, #tpu.memory_space<vmem>>, %arg2: memref<32x128xf32, #tpu.memory_space<vmem>>, %arg3: memref<32x128xf32, #tpu.memory_space<vmem>>, %arg4: memref<1x128xf32, #tpu.memory_space<vmem>>, %arg5: memref<32x32xf32, #tpu.memory_space<vmem>>, %arg6: memref<1x32xf32, #tpu.memory_space<vmem>>, %arg7: memref<32x32xf32, #tpu.memory_space<vmem>>, %arg8: memref<1x32xf32, #tpu.memory_space<vmem>>, %arg9: memref<8x8x32xf32, #tpu.memory_space<vmem>>, %arg10: memref<64x128xf32, #tpu.memory_space<vmem>>, %arg11: memref<64x32xf32, #tpu.memory_space<vmem>>) attributes {dimension_semantics = [#tpu.dimension_semantics<parallel>], iteration_bounds = array<i64: 1>, scalar_prefetch = 0 : i64, scratch_operands = 2 : i64, tpu.core_type = #tpu.core_type<tc>, window_params = [{transform_indices = @transform_0, window_bounds = array<i64: 8, 8, 32>}, {pipeline_mode = #tpu.pipeline_mode<synchronous>, transform_indices = @transform_1, window_bounds = array<i64: 32, 128>}, {pipeline_mode = #tpu.pipeline_mode<synchronous>, transform_indices = @transform_2, window_bounds = array<i64: 32, 128>}, {pipeline_mode = #tpu.pipeline_mode<synchronous>, transform_indices = @transform_3, window_bounds = array<i64: 1, 128>}, {pipeline_mode = #tpu.pipeline_mode<synchronous>, transform_indices = @transform_4, window_bounds = array<i64: 32, 32>}, {pipeline_mode = #tpu.pipeline_mode<synchronous>, transform_indices = @transform_5, window_bounds = array<i64: 1, 32>}, {pipeline_mode = #tpu.pipeline_mode<synchronous>, transform_indices = @transform_6, window_bounds = array<i64: 32, 32>}, {pipeline_mode = #tpu.pipeline_mode<synchronous>, transform_indices = @transform_7, window_bounds = array<i64: 1, 32>}, {transform_indices = @transform_8, window_bounds = array<i64: 8, 8, 32>}]} {
    %c0 = arith.constant 0 : index
    %c0_0 = arith.constant 0 : index
    %c0_1 = arith.constant 0 : index
    %0 = vector.load %arg1[%c0, %c0_0, %c0_1] : memref<8x8x32xf32, #tpu.memory_space<vmem>>, vector<8x8x32xf32>
    %1 = vector.shape_cast %0 : vector<8x8x32xf32> to vector<64x32xf32>
    %c0_2 = arith.constant 0 : index
    %c0_3 = arith.constant 0 : index
    %2 = vector.load %arg2[%c0_2, %c0_3] : memref<32x128xf32, #tpu.memory_space<vmem>>, vector<32x128xf32>
    %cst = arith.constant dense<0.000000e+00> : vector<64x128xf32>
    %3 = tpu.matmul %1, %2, %cst {dimension_numbers = #tpu.dot_dimension_numbers<[1], [0], [0], [1], [0, 0, 1, 1], [], []>} : vector<64x32xf32>, vector<32x128xf32>, vector<64x128xf32> -> vector<64x128xf32>
    %c0_4 = arith.constant 0 : index
    %c0_5 = arith.constant 0 : index
    %4 = vector.load %arg4[%c0_4, %c0_5] : memref<1x128xf32, #tpu.memory_space<vmem>>, vector<1x128xf32>
    %5 = vector.broadcast %4 : vector<1x128xf32> to vector<64x128xf32>
    %6 = arith.addf %3, %5 : vector<64x128xf32>
    %c0_6 = arith.constant 0 : index
    %c0_7 = arith.constant 0 : index
    %7 = vector.load %arg10[%c0_6, %c0_7] : memref<64x128xf32, #tpu.memory_space<vmem>>, vector<64x128xf32>
    tpu.vector_store %arg10[%c0_6, %c0_7], %6 {strides = array<i32>} : memref<64x128xf32, #tpu.memory_space<vmem>>, vector<64x128xf32>,
    %c0_8 = arith.constant 0 : index
    %c0_9 = arith.constant 0 : index
    %8 = vector.load %arg3[%c0_8, %c0_9] : memref<32x128xf32, #tpu.memory_space<vmem>>, vector<32x128xf32>
    %9 = tpu.iota {dimensions = array<i32: 1>} : vector<8x128xi32>
    %c64_i32 = arith.constant 64 : i32
    %10 = vector.broadcast %c64_i32 : i32 to vector<8x128xi32>
    %11 = arith.cmpi sge, %9, %10 : vector<8x128xi32>
    %c96_i32 = arith.constant 96 : i32
    %12 = vector.broadcast %c96_i32 : i32 to vector<8x128xi32>
    %13 = arith.cmpi slt, %9, %12 : vector<8x128xi32>
    %14 = arith.andi %11, %13 : vector<8x128xi1>
    %cst_10 = arith.constant 0.000000e+00 : f32
    %15 = vector.broadcast %cst_10 : f32 to vector<8x32xf32>
    %cst_11 = arith.constant 0.000000e+00 : f32
    %16 = vector.broadcast %cst_11 : f32 to vector<8x32xf32>
    %c0_i32 = arith.constant 0 : i32
    %c8_i32 = arith.constant 8 : i32
    %17 = arith.muli %c0_i32, %c8_i32 : i32
    %18 = tpu.assume_multiple %17, 8 : i32
    %19 = arith.index_cast %18 : i32 to index
    %c0_12 = arith.constant 0 : index
    %20 = vector.load %arg10[%19, %c0_12] : memref<64x128xf32, #tpu.memory_space<vmem>>, vector<8x128xf32>
    %cst_13 = arith.constant dense<0.000000e+00> : vector<8x128xf32>
    %21 = tpu.matmul %15, %8, %cst_13 {dimension_numbers = #tpu.dot_dimension_numbers<[1], [0], [0], [1], [0, 0, 1, 1], [], []>} : vector<8x32xf32>, vector<32x128xf32>, vector<8x128xf32> -> vector<8x128xf32>
    %22 = arith.addf %20, %21 : vector<8x128xf32>
    %23 = math.tanh %22 : vector<8x128xf32>
    %24 = arith.negf %22 : vector<8x128xf32>
    %25 = math.exp %24 : vector<8x128xf32>
    %cst_14 = arith.constant 1.000000e+00 : f32
    %26 = vector.broadcast %cst_14 : f32 to vector<8x128xf32>
    %27 = arith.addf %26, %25 : vector<8x128xf32>
    %28 = arith.divf %26, %27 : vector<8x128xf32>
    %29 = arith.select %14, %23, %28 : vector<8x128xi1>, vector<8x128xf32>
    %30 = vector.extract_strided_slice %29 {offsets = [0, 0], sizes = [8, 32], strides = [1, 1]} : vector<8x128xf32> to vector<8x32xf32>
    %31 = vector.extract_strided_slice %29 {offsets = [0, 32], sizes = [8, 32], strides = [1, 1]} : vector<8x128xf32> to vector<8x32xf32>
    %32 = vector.extract_strided_slice %29 {offsets = [0, 64], sizes = [8, 32], strides = [1, 1]} : vector<8x128xf32> to vector<8x32xf32>
    %33 = vector.extract_strided_slice %29 {offsets = [0, 96], sizes = [8, 32], strides = [1, 1]} : vector<8x128xf32> to vector<8x32xf32>
    %34 = arith.mulf %31, %16 : vector<8x32xf32>
    %35 = arith.mulf %30, %32 : vector<8x32xf32>
    %36 = arith.addf %34, %35 : vector<8x32xf32>
    %37 = math.tanh %36 : vector<8x32xf32>
    %38 = arith.mulf %33, %37 : vector<8x32xf32>
    %39 = arith.index_cast %18 : i32 to index
    %c0_15 = arith.constant 0 : index
    %40 = vector.load %arg11[%39, %c0_15] : memref<64x32xf32, #tpu.memory_space<vmem>>, vector<8x32xf32>
    tpu.vector_store %arg11[%39, %c0_15], %38 {strides = array<i32>} : memref<64x32xf32, #tpu.memory_space<vmem>>, vector<8x32xf32>,
    %c1_i32 = arith.constant 1 : i32
    %c8_i32_16 = arith.constant 8 : i32
    %41 = arith.muli %c1_i32, %c8_i32_16 : i32
    %42 = tpu.assume_multiple %41, 8 : i32
    %43 = arith.index_cast %42 : i32 to index
    %c0_17 = arith.constant 0 : index
    %44 = vector.load %arg10[%43, %c0_17] : memref<64x128xf32, #tpu.memory_space<vmem>>, vector<8x128xf32>
    %cst_18 = arith.constant dense<0.000000e+00> : vector<8x128xf32>
    %45 = tpu.matmul %38, %8, %cst_18 {dimension_numbers = #tpu.dot_dimension_numbers<[1], [0], [0], [1], [0, 0, 1, 1], [], []>} : vector<8x32xf32>, vector<32x128xf32>, vector<8x128xf32> -> vector<8x128xf32>
    %46 = arith.addf %44, %45 : vector<8x128xf32>
    %47 = math.tanh %46 : vector<8x128xf32>
    %48 = arith.negf %46 : vector<8x128xf32>
    %49 = math.exp %48 : vector<8x128xf32>
    %cst_19 = arith.constant 1.000000e+00 : f32
    %50 = vector.broadcast %cst_19 : f32 to vector<8x128xf32>
    %51 = arith.addf %50, %49 : vector<8x128xf32>
    %52 = arith.divf %50, %51 : vector<8x128xf32>
    %53 = arith.select %14, %47, %52 : vector<8x128xi1>, vector<8x128xf32>
    %54 = vector.extract_strided_slice %53 {offsets = [0, 0], sizes = [8, 32], strides = [1, 1]} : vector<8x128xf32> to vector<8x32xf32>
    %55 = vector.extract_strided_slice %53 {offsets = [0, 32], sizes = [8, 32], strides = [1, 1]} : vector<8x128xf32> to vector<8x32xf32>
    %56 = vector.extract_strided_slice %53 {offsets = [0, 64], sizes = [8, 32], strides = [1, 1]} : vector<8x128xf32> to vector<8x32xf32>
    %57 = vector.extract_strided_slice %53 {offsets = [0, 96], sizes = [8, 32], strides = [1, 1]} : vector<8x128xf32> to vector<8x32xf32>
    %58 = arith.mulf %55, %36 : vector<8x32xf32>
    %59 = arith.mulf %54, %56 : vector<8x32xf32>
    %60 = arith.addf %58, %59 : vector<8x32xf32>
    %61 = math.tanh %60 : vector<8x32xf32>
    %62 = arith.mulf %57, %61 : vector<8x32xf32>
    %63 = arith.index_cast %42 : i32 to index
    %c0_20 = arith.constant 0 : index
    %64 = vector.load %arg11[%63, %c0_20] : memref<64x32xf32, #tpu.memory_space<vmem>>, vector<8x32xf32>
    tpu.vector_store %arg11[%63, %c0_20], %62 {strides = array<i32>} : memref<64x32xf32, #tpu.memory_space<vmem>>, vector<8x32xf32>,
    %c2_i32 = arith.constant 2 : i32
    %c8_i32_21 = arith.constant 8 : i32
    %65 = arith.muli %c2_i32, %c8_i32_21 : i32
    %66 = tpu.assume_multiple %65, 8 : i32
    %67 = arith.index_cast %66 : i32 to index
    %c0_22 = arith.constant 0 : index
    %68 = vector.load %arg10[%67, %c0_22] : memref<64x128xf32, #tpu.memory_space<vmem>>, vector<8x128xf32>
    %cst_23 = arith.constant dense<0.000000e+00> : vector<8x128xf32>
    %69 = tpu.matmul %62, %8, %cst_23 {dimension_numbers = #tpu.dot_dimension_numbers<[1], [0], [0], [1], [0, 0, 1, 1], [], []>} : vector<8x32xf32>, vector<32x128xf32>, vector<8x128xf32> -> vector<8x128xf32>
    %70 = arith.addf %68, %69 : vector<8x128xf32>
    %71 = math.tanh %70 : vector<8x128xf32>
    %72 = arith.negf %70 : vector<8x128xf32>
    %73 = math.exp %72 : vector<8x128xf32>
    %cst_24 = arith.constant 1.000000e+00 : f32
    %74 = vector.broadcast %cst_24 : f32 to vector<8x128xf32>
    %75 = arith.addf %74, %73 : vector<8x128xf32>
    %76 = arith.divf %74, %75 : vector<8x128xf32>
    %77 = arith.select %14, %71, %76 : vector<8x128xi1>, vector<8x128xf32>
    %78 = vector.extract_strided_slice %77 {offsets = [0, 0], sizes = [8, 32], strides = [1, 1]} : vector<8x128xf32> to vector<8x32xf32>
    %79 = vector.extract_strided_slice %77 {offsets = [0, 32], sizes = [8, 32], strides = [1, 1]} : vector<8x128xf32> to vector<8x32xf32>
    %80 = vector.extract_strided_slice %77 {offsets = [0, 64], sizes = [8, 32], strides = [1, 1]} : vector<8x128xf32> to vector<8x32xf32>
    %81 = vector.extract_strided_slice %77 {offsets = [0, 96], sizes = [8, 32], strides = [1, 1]} : vector<8x128xf32> to vector<8x32xf32>
    %82 = arith.mulf %79, %60 : vector<8x32xf32>
    %83 = arith.mulf %78, %80 : vector<8x32xf32>
    %84 = arith.addf %82, %83 : vector<8x32xf32>
    %85 = math.tanh %84 : vector<8x32xf32>
    %86 = arith.mulf %81, %85 : vector<8x32xf32>
    %87 = arith.index_cast %66 : i32 to index
    %c0_25 = arith.constant 0 : index
    %88 = vector.load %arg11[%87, %c0_25] : memref<64x32xf32, #tpu.memory_space<vmem>>, vector<8x32xf32>
    tpu.vector_store %arg11[%87, %c0_25], %86 {strides = array<i32>} : memref<64x32xf32, #tpu.memory_space<vmem>>, vector<8x32xf32>,
    %c3_i32 = arith.constant 3 : i32
    %c8_i32_26 = arith.constant 8 : i32
    %89 = arith.muli %c3_i32, %c8_i32_26 : i32
    %90 = tpu.assume_multiple %89, 8 : i32
    %91 = arith.index_cast %90 : i32 to index
    %c0_27 = arith.constant 0 : index
    %92 = vector.load %arg10[%91, %c0_27] : memref<64x128xf32, #tpu.memory_space<vmem>>, vector<8x128xf32>
    %cst_28 = arith.constant dense<0.000000e+00> : vector<8x128xf32>
    %93 = tpu.matmul %86, %8, %cst_28 {dimension_numbers = #tpu.dot_dimension_numbers<[1], [0], [0], [1], [0, 0, 1, 1], [], []>} : vector<8x32xf32>, vector<32x128xf32>, vector<8x128xf32> -> vector<8x128xf32>
    %94 = arith.addf %92, %93 : vector<8x128xf32>
    %95 = math.tanh %94 : vector<8x128xf32>
    %96 = arith.negf %94 : vector<8x128xf32>
    %97 = math.exp %96 : vector<8x128xf32>
    %cst_29 = arith.constant 1.000000e+00 : f32
    %98 = vector.broadcast %cst_29 : f32 to vector<8x128xf32>
    %99 = arith.addf %98, %97 : vector<8x128xf32>
    %100 = arith.divf %98, %99 : vector<8x128xf32>
    %101 = arith.select %14, %95, %100 : vector<8x128xi1>, vector<8x128xf32>
    %102 = vector.extract_strided_slice %101 {offsets = [0, 0], sizes = [8, 32], strides = [1, 1]} : vector<8x128xf32> to vector<8x32xf32>
    %103 = vector.extract_strided_slice %101 {offsets = [0, 32], sizes = [8, 32], strides = [1, 1]} : vector<8x128xf32> to vector<8x32xf32>
    %104 = vector.extract_strided_slice %101 {offsets = [0, 64], sizes = [8, 32], strides = [1, 1]} : vector<8x128xf32> to vector<8x32xf32>
    %105 = vector.extract_strided_slice %101 {offsets = [0, 96], sizes = [8, 32], strides = [1, 1]} : vector<8x128xf32> to vector<8x32xf32>
    %106 = arith.mulf %103, %84 : vector<8x32xf32>
    %107 = arith.mulf %102, %104 : vector<8x32xf32>
    %108 = arith.addf %106, %107 : vector<8x32xf32>
    %109 = math.tanh %108 : vector<8x32xf32>
    %110 = arith.mulf %105, %109 : vector<8x32xf32>
    %111 = arith.index_cast %90 : i32 to index
    %c0_30 = arith.constant 0 : index
    %112 = vector.load %arg11[%111, %c0_30] : memref<64x32xf32, #tpu.memory_space<vmem>>, vector<8x32xf32>
    tpu.vector_store %arg11[%111, %c0_30], %110 {strides = array<i32>} : memref<64x32xf32, #tpu.memory_space<vmem>>, vector<8x32xf32>,
    %c4_i32 = arith.constant 4 : i32
    %c8_i32_31 = arith.constant 8 : i32
    %113 = arith.muli %c4_i32, %c8_i32_31 : i32
    %114 = tpu.assume_multiple %113, 8 : i32
    %115 = arith.index_cast %114 : i32 to index
    %c0_32 = arith.constant 0 : index
    %116 = vector.load %arg10[%115, %c0_32] : memref<64x128xf32, #tpu.memory_space<vmem>>, vector<8x128xf32>
    %cst_33 = arith.constant dense<0.000000e+00> : vector<8x128xf32>
    %117 = tpu.matmul %110, %8, %cst_33 {dimension_numbers = #tpu.dot_dimension_numbers<[1], [0], [0], [1], [0, 0, 1, 1], [], []>} : vector<8x32xf32>, vector<32x128xf32>, vector<8x128xf32> -> vector<8x128xf32>
    %118 = arith.addf %116, %117 : vector<8x128xf32>
    %119 = math.tanh %118 : vector<8x128xf32>
    %120 = arith.negf %118 : vector<8x128xf32>
    %121 = math.exp %120 : vector<8x128xf32>
    %cst_34 = arith.constant 1.000000e+00 : f32
    %122 = vector.broadcast %cst_34 : f32 to vector<8x128xf32>
    %123 = arith.addf %122, %121 : vector<8x128xf32>
    %124 = arith.divf %122, %123 : vector<8x128xf32>
    %125 = arith.select %14, %119, %124 : vector<8x128xi1>, vector<8x128xf32>
    %126 = vector.extract_strided_slice %125 {offsets = [0, 0], sizes = [8, 32], strides = [1, 1]} : vector<8x128xf32> to vector<8x32xf32>
    %127 = vector.extract_strided_slice %125 {offsets = [0, 32], sizes = [8, 32], strides = [1, 1]} : vector<8x128xf32> to vector<8x32xf32>
    %128 = vector.extract_strided_slice %125 {offsets = [0, 64], sizes = [8, 32], strides = [1, 1]} : vector<8x128xf32> to vector<8x32xf32>
    %129 = vector.extract_strided_slice %125 {offsets = [0, 96], sizes = [8, 32], strides = [1, 1]} : vector<8x128xf32> to vector<8x32xf32>
    %130 = arith.mulf %127, %108 : vector<8x32xf32>
    %131 = arith.mulf %126, %128 : vector<8x32xf32>
    %132 = arith.addf %130, %131 : vector<8x32xf32>
    %133 = math.tanh %132 : vector<8x32xf32>
    %134 = arith.mulf %129, %133 : vector<8x32xf32>
    %135 = arith.index_cast %114 : i32 to index
    %c0_35 = arith.constant 0 : index
    %136 = vector.load %arg11[%135, %c0_35] : memref<64x32xf32, #tpu.memory_space<vmem>>, vector<8x32xf32>
    tpu.vector_store %arg11[%135, %c0_35], %134 {strides = array<i32>} : memref<64x32xf32, #tpu.memory_space<vmem>>, vector<8x32xf32>,
    %c5_i32 = arith.constant 5 : i32
    %c8_i32_36 = arith.constant 8 : i32
    %137 = arith.muli %c5_i32, %c8_i32_36 : i32
    %138 = tpu.assume_multiple %137, 8 : i32
    %139 = arith.index_cast %138 : i32 to index
    %c0_37 = arith.constant 0 : index
    %140 = vector.load %arg10[%139, %c0_37] : memref<64x128xf32, #tpu.memory_space<vmem>>, vector<8x128xf32>
    %cst_38 = arith.constant dense<0.000000e+00> : vector<8x128xf32>
    %141 = tpu.matmul %134, %8, %cst_38 {dimension_numbers = #tpu.dot_dimension_numbers<[1], [0], [0], [1], [0, 0, 1, 1], [], []>} : vector<8x32xf32>, vector<32x128xf32>, vector<8x128xf32> -> vector<8x128xf32>
    %142 = arith.addf %140, %141 : vector<8x128xf32>
    %143 = math.tanh %142 : vector<8x128xf32>
    %144 = arith.negf %142 : vector<8x128xf32>
    %145 = math.exp %144 : vector<8x128xf32>
    %cst_39 = arith.constant 1.000000e+00 : f32
    %146 = vector.broadcast %cst_39 : f32 to vector<8x128xf32>
    %147 = arith.addf %146, %145 : vector<8x128xf32>
    %148 = arith.divf %146, %147 : vector<8x128xf32>
    %149 = arith.select %14, %143, %148 : vector<8x128xi1>, vector<8x128xf32>
    %150 = vector.extract_strided_slice %149 {offsets = [0, 0], sizes = [8, 32], strides = [1, 1]} : vector<8x128xf32> to vector<8x32xf32>
    %151 = vector.extract_strided_slice %149 {offsets = [0, 32], sizes = [8, 32], strides = [1, 1]} : vector<8x128xf32> to vector<8x32xf32>
    %152 = vector.extract_strided_slice %149 {offsets = [0, 64], sizes = [8, 32], strides = [1, 1]} : vector<8x128xf32> to vector<8x32xf32>
    %153 = vector.extract_strided_slice %149 {offsets = [0, 96], sizes = [8, 32], strides = [1, 1]} : vector<8x128xf32> to vector<8x32xf32>
    %154 = arith.mulf %151, %132 : vector<8x32xf32>
    %155 = arith.mulf %150, %152 : vector<8x32xf32>
    %156 = arith.addf %154, %155 : vector<8x32xf32>
    %157 = math.tanh %156 : vector<8x32xf32>
    %158 = arith.mulf %153, %157 : vector<8x32xf32>
    %159 = arith.index_cast %138 : i32 to index
    %c0_40 = arith.constant 0 : index
    %160 = vector.load %arg11[%159, %c0_40] : memref<64x32xf32, #tpu.memory_space<vmem>>, vector<8x32xf32>
    tpu.vector_store %arg11[%159, %c0_40], %158 {strides = array<i32>} : memref<64x32xf32, #tpu.memory_space<vmem>>, vector<8x32xf32>,
    %c6_i32 = arith.constant 6 : i32
    %c8_i32_41 = arith.constant 8 : i32
    %161 = arith.muli %c6_i32, %c8_i32_41 : i32
    %162 = tpu.assume_multiple %161, 8 : i32
    %163 = arith.index_cast %162 : i32 to index
    %c0_42 = arith.constant 0 : index
    %164 = vector.load %arg10[%163, %c0_42] : memref<64x128xf32, #tpu.memory_space<vmem>>, vector<8x128xf32>
    %cst_43 = arith.constant dense<0.000000e+00> : vector<8x128xf32>
    %165 = tpu.matmul %158, %8, %cst_43 {dimension_numbers = #tpu.dot_dimension_numbers<[1], [0], [0], [1], [0, 0, 1, 1], [], []>} : vector<8x32xf32>, vector<32x128xf32>, vector<8x128xf32> -> vector<8x128xf32>
    %166 = arith.addf %164, %165 : vector<8x128xf32>
    %167 = math.tanh %166 : vector<8x128xf32>
    %168 = arith.negf %166 : vector<8x128xf32>
    %169 = math.exp %168 : vector<8x128xf32>
    %cst_44 = arith.constant 1.000000e+00 : f32
    %170 = vector.broadcast %cst_44 : f32 to vector<8x128xf32>
    %171 = arith.addf %170, %169 : vector<8x128xf32>
    %172 = arith.divf %170, %171 : vector<8x128xf32>
    %173 = arith.select %14, %167, %172 : vector<8x128xi1>, vector<8x128xf32>
    %174 = vector.extract_strided_slice %173 {offsets = [0, 0], sizes = [8, 32], strides = [1, 1]} : vector<8x128xf32> to vector<8x32xf32>
    %175 = vector.extract_strided_slice %173 {offsets = [0, 32], sizes = [8, 32], strides = [1, 1]} : vector<8x128xf32> to vector<8x32xf32>
    %176 = vector.extract_strided_slice %173 {offsets = [0, 64], sizes = [8, 32], strides = [1, 1]} : vector<8x128xf32> to vector<8x32xf32>
    %177 = vector.extract_strided_slice %173 {offsets = [0, 96], sizes = [8, 32], strides = [1, 1]} : vector<8x128xf32> to vector<8x32xf32>
    %178 = arith.mulf %175, %156 : vector<8x32xf32>
    %179 = arith.mulf %174, %176 : vector<8x32xf32>
    %180 = arith.addf %178, %179 : vector<8x32xf32>
    %181 = math.tanh %180 : vector<8x32xf32>
    %182 = arith.mulf %177, %181 : vector<8x32xf32>
    %183 = arith.index_cast %162 : i32 to index
    %c0_45 = arith.constant 0 : index
    %184 = vector.load %arg11[%183, %c0_45] : memref<64x32xf32, #tpu.memory_space<vmem>>, vector<8x32xf32>
    tpu.vector_store %arg11[%183, %c0_45], %182 {strides = array<i32>} : memref<64x32xf32, #tpu.memory_space<vmem>>, vector<8x32xf32>,
    %c7_i32 = arith.constant 7 : i32
    %c8_i32_46 = arith.constant 8 : i32
    %185 = arith.muli %c7_i32, %c8_i32_46 : i32
    %186 = tpu.assume_multiple %185, 8 : i32
    %187 = arith.index_cast %186 : i32 to index
    %c0_47 = arith.constant 0 : index
    %188 = vector.load %arg10[%187, %c0_47] : memref<64x128xf32, #tpu.memory_space<vmem>>, vector<8x128xf32>
    %cst_48 = arith.constant dense<0.000000e+00> : vector<8x128xf32>
    %189 = tpu.matmul %182, %8, %cst_48 {dimension_numbers = #tpu.dot_dimension_numbers<[1], [0], [0], [1], [0, 0, 1, 1], [], []>} : vector<8x32xf32>, vector<32x128xf32>, vector<8x128xf32> -> vector<8x128xf32>
    %190 = arith.addf %188, %189 : vector<8x128xf32>
    %191 = math.tanh %190 : vector<8x128xf32>
    %192 = arith.negf %190 : vector<8x128xf32>
    %193 = math.exp %192 : vector<8x128xf32>
    %cst_49 = arith.constant 1.000000e+00 : f32
    %194 = vector.broadcast %cst_49 : f32 to vector<8x128xf32>
    %195 = arith.addf %194, %193 : vector<8x128xf32>
    %196 = arith.divf %194, %195 : vector<8x128xf32>
    %197 = arith.select %14, %191, %196 : vector<8x128xi1>, vector<8x128xf32>
    %198 = vector.extract_strided_slice %197 {offsets = [0, 0], sizes = [8, 32], strides = [1, 1]} : vector<8x128xf32> to vector<8x32xf32>
    %199 = vector.extract_strided_slice %197 {offsets = [0, 32], sizes = [8, 32], strides = [1, 1]} : vector<8x128xf32> to vector<8x32xf32>
    %200 = vector.extract_strided_slice %197 {offsets = [0, 64], sizes = [8, 32], strides = [1, 1]} : vector<8x128xf32> to vector<8x32xf32>
    %201 = vector.extract_strided_slice %197 {offsets = [0, 96], sizes = [8, 32], strides = [1, 1]} : vector<8x128xf32> to vector<8x32xf32>
    %202 = arith.mulf %199, %180 : vector<8x32xf32>
    %203 = arith.mulf %198, %200 : vector<8x32xf32>
    %204 = arith.addf %202, %203 : vector<8x32xf32>
    %205 = math.tanh %204 : vector<8x32xf32>
    %206 = arith.mulf %201, %205 : vector<8x32xf32>
    %207 = arith.index_cast %186 : i32 to index
    %c0_50 = arith.constant 0 : index
    %208 = vector.load %arg11[%207, %c0_50] : memref<64x32xf32, #tpu.memory_space<vmem>>, vector<8x32xf32>
    tpu.vector_store %arg11[%207, %c0_50], %206 {strides = array<i32>} : memref<64x32xf32, #tpu.memory_space<vmem>>, vector<8x32xf32>,
    %c8_i32_51 = arith.constant 8 : i32
    %c0_52 = arith.constant 0 : index
    %c0_53 = arith.constant 0 : index
    %209 = vector.load %arg5[%c0_52, %c0_53] : memref<32x32xf32, #tpu.memory_space<vmem>>, vector<32x32xf32>
    %cst_54 = arith.constant dense<0.000000e+00> : vector<8x32xf32>
    %210 = tpu.matmul %206, %209, %cst_54 {dimension_numbers = #tpu.dot_dimension_numbers<[1], [0], [0], [1], [0, 0, 1, 1], [], []>} : vector<8x32xf32>, vector<32x32xf32>, vector<8x32xf32> -> vector<8x32xf32>
    %c0_55 = arith.constant 0 : index
    %c0_56 = arith.constant 0 : index
    %211 = vector.load %arg6[%c0_55, %c0_56] : memref<1x32xf32, #tpu.memory_space<vmem>>, vector<1x32xf32>
    %212 = vector.broadcast %211 : vector<1x32xf32> to vector<8x32xf32>
    %213 = arith.addf %210, %212 : vector<8x32xf32>
    %214 = arith.negf %213 : vector<8x32xf32>
    %215 = math.exp %214 : vector<8x32xf32>
    %cst_57 = arith.constant 1.000000e+00 : f32
    %216 = vector.broadcast %cst_57 : f32 to vector<8x32xf32>
    %217 = arith.addf %216, %215 : vector<8x32xf32>
    %218 = arith.divf %216, %217 : vector<8x32xf32>
    %219 = arith.mulf %213, %218 : vector<8x32xf32>
    %c0_58 = arith.constant 0 : index
    %c0_59 = arith.constant 0 : index
    %220 = vector.load %arg11[%c0_58, %c0_59] : memref<64x32xf32, #tpu.memory_space<vmem>>, vector<64x32xf32>
    %221 = vector.shape_cast %220 : vector<64x32xf32> to vector<8x8x32xf32>
    %222 = vector.shape_cast %219 : vector<8x32xf32> to vector<1x8x32xf32>
    %223 = vector.broadcast %222 : vector<1x8x32xf32> to vector<8x8x32xf32>
    %224 = arith.mulf %221, %223 : vector<8x8x32xf32>
    %225 = vector.shape_cast %224 : vector<8x8x32xf32> to vector<64x32xf32>
    %c0_60 = arith.constant 0 : index
    %c0_61 = arith.constant 0 : index
    %226 = vector.load %arg7[%c0_60, %c0_61] : memref<32x32xf32, #tpu.memory_space<vmem>>, vector<32x32xf32>
    %cst_62 = arith.constant dense<0.000000e+00> : vector<64x32xf32>
    %227 = tpu.matmul %225, %226, %cst_62 {dimension_numbers = #tpu.dot_dimension_numbers<[1], [0], [0], [1], [0, 0, 1, 1], [], []>} : vector<64x32xf32>, vector<32x32xf32>, vector<64x32xf32> -> vector<64x32xf32>
    %c0_63 = arith.constant 0 : index
    %c0_64 = arith.constant 0 : index
    %228 = vector.load %arg8[%c0_63, %c0_64] : memref<1x32xf32, #tpu.memory_space<vmem>>, vector<1x32xf32>
    %229 = vector.broadcast %228 : vector<1x32xf32> to vector<64x32xf32>
    %230 = arith.addf %227, %229 : vector<64x32xf32>
    %231 = vector.shape_cast %230 : vector<64x32xf32> to vector<8x8x32xf32>
    %c0_65 = arith.constant 0 : index
    %c0_66 = arith.constant 0 : index
    %c0_67 = arith.constant 0 : index
    %232 = vector.load %arg9[%c0_65, %c0_66, %c0_67] : memref<8x8x32xf32, #tpu.memory_space<vmem>>, vector<8x8x32xf32>
    tpu.vector_store %arg9[%c0_65, %c0_66, %c0_67], %231 {strides = array<i32>} : memref<8x8x32xf32, #tpu.memory_space<vmem>>, vector<8x8x32xf32>,
    return
  }
  func.func @transform_0(%arg0: i32) -> (i32, i32, i32) {
    %c0_i32 = arith.constant 0 : i32
    %c0_i32_0 = arith.constant 0 : i32
    %c0_i32_1 = arith.constant 0 : i32
    return %c0_i32, %arg0, %c0_i32_0 : i32, i32, i32
  }
  func.func @transform_1(%arg0: i32) -> (i32, i32) {
    %c0_i32 = arith.constant 0 : i32
    %c0_i32_0 = arith.constant 0 : i32
    %c0_i32_1 = arith.constant 0 : i32
    return %c0_i32, %c0_i32_0 : i32, i32
  }
  func.func @transform_2(%arg0: i32) -> (i32, i32) {
    %c0_i32 = arith.constant 0 : i32
    %c0_i32_0 = arith.constant 0 : i32
    %c0_i32_1 = arith.constant 0 : i32
    return %c0_i32, %c0_i32_0 : i32, i32
  }
  func.func @transform_3(%arg0: i32) -> (i32, i32) {
    %c0_i32 = arith.constant 0 : i32
    %c0_i32_0 = arith.constant 0 : i32
    %c0_i32_1 = arith.constant 0 : i32
    return %c0_i32, %c0_i32_0 : i32, i32
  }
  func.func @transform_4(%arg0: i32) -> (i32, i32) {
    %c0_i32 = arith.constant 0 : i32
    %c0_i32_0 = arith.constant 0 : i32
    %c0_i32_1 = arith.constant 0 : i32
    return %c0_i32, %c0_i32_0 : i32, i32
  }
  func.func @transform_5(%arg0: i32) -> (i32, i32) {
    %c0_i32 = arith.constant 0 : i32
    %c0_i32_0 = arith.constant 0 : i32
    %c0_i32_1 = arith.constant 0 : i32
    return %c0_i32, %c0_i32_0 : i32, i32
  }
  func.func @transform_6(%arg0: i32) -> (i32, i32) {
    %c0_i32 = arith.constant 0 : i32
    %c0_i32_0 = arith.constant 0 : i32
    %c0_i32_1 = arith.constant 0 : i32
    return %c0_i32, %c0_i32_0 : i32, i32
  }
  func.func @transform_7(%arg0: i32) -> (i32, i32) {
    %c0_i32 = arith.constant 0 : i32
    %c0_i32_0 = arith.constant 0 : i32
    %c0_i32_1 = arith.constant 0 : i32
    return %c0_i32, %c0_i32_0 : i32, i32
  }
  func.func @transform_8(%arg0: i32) -> (i32, i32, i32) {
    %c0_i32 = arith.constant 0 : i32
    %c0_i32_0 = arith.constant 0 : i32
    %c0_i32_1 = arith.constant 0 : i32
    return %c0_i32, %arg0, %c0_i32_0 : i32, i32, i32
  }
}

</mosaic_0001>

<bundles_post_ra>
// kernel: razonbill_forward.1
= control target key start
LH: loop header
LB: loop body
LE: loop exit
PB: predicated region body
PF: predicated region fallthrough
CT: control target
= control target key end

     0   :  { %vm48_vm0 = vcmask 261120   ;;  %v1687_v3 = vmov 0.0|0.0   ;;  %vm1688_vm1 = vmmov 0   ;;  %v1689_v4 = vmov 0.0   ;;  %s1691_s14 = smov 32   ;;  %s2009_s1 = inlined_call_operand.vmem [shape: f32[32,128], index: 1, kind: input, shape index: {}]   ;;  %s2010_s0 = inlined_call_operand.vmem [shape: f32[8,8,32], index: 0, kind: input, shape index: {}]   ;;  %s2011_s2 = inlined_call_operand.vmem [shape: f32[32,128], index: 2, kind: input, shape index: {}]   ;;  %s2012_s3 = inlined_call_operand.vmem [shape: f32[1,128], index: 3, kind: input, shape index: {}]   ;;  %s2013_s4 = inlined_call_operand.vmem [shape: f32[32,32], index: 4, kind: input, shape index: {}]   ;;  %s2014_s6 = inlined_call_operand.vmem [shape: f32[32,32], index: 6, kind: input, shape index: {}]   ;;  %s2015_s5 = inlined_call_operand.vmem [shape: f32[1,32], index: 5, kind: input, shape index: {}]   ;;  %s2016_s7 = inlined_call_operand.vmem [shape: f32[1,32], index: 7, kind: input, shape index: {}]   ;;  %s2017_s8 = inlined_call_operand.vmem [shape: f32[8,8,32], index: 8, kind: output, shape index: {}]  }
   0x1   :  { %v37_v0 = vld [vmem:[%s2009_s1] sm:$0xff]  ;;  %v38_v1 = vld [vmem:[%s2009_s1 + $0x8] sm:$0xff]  ;;  %v39_v2 = vld [vmem:[%s2009_s1 + $0x10] sm:$0xff]  ;;  %1558 = vmatprep.subr.bf16.mxu1 %v1687_v3  ;;  %1444 = vmatprep.mubr.msk.f32.mxu1 %vm1688_vm1, %v1689_v4  ;;  %v190_v44 = vlaneseq }
   0x2   :  { %v1544_v5 = vpack.c.bf16 %v38_v1, %v37_v0  ;;  %v40_v6 = vld [vmem:[%s2009_s1 + $0x18] sm:$0xff]  ;;  %v29_v7 = vld [vmem:[%s2010_s0] sm:$0xff]  ;;  %v187_v10 = vld [vmem:[%s2011_s2 + $0x8] sm:$0xff] }
   0x3   :  { %v1548_v8 = vpack.c.bf16 %v40_v6, %v39_v2  ;;  %1413 = vmatprep.mubr.msk.f32.mxu0 %vm48_vm0, %v29_v7  ;;  %v186_v9 = vld [vmem:[%s2011_s2] sm:$0xff]  ;;  %v188_v12 = vld [vmem:[%s2011_s2 + $0x10] sm:$0xff]  ;;  %v189_v13 = vld [vmem:[%s2011_s2 + $0x18] sm:$0xff]  ;;  %v191_v46 = vand.u32 127, %v190_v44 }
   0x4   :  { %1545 = vmatprep.subr.bf16.mxu0 %v1544_v5  ;;  %v1762_v11 = vpack.c.bf16 %v187_v10, %v186_v9  ;;  %v1772_v14 = vpack.c.bf16 %v189_v13, %v188_v12  ;;  %v30_v15 = vld [vmem:[%s2010_s0 + $0x8] sm:$0xff]  ;;  %v31_v16 = vld [vmem:[%s2010_s0 + $0x10] sm:$0xff]  ;;  %v32_v17 = vld [vmem:[%s2010_s0 + $0x18] sm:$0xff] }
   0x5   :  { %1547 = vmatpush3.bf16.msra.mxu0 %v1544_v5  ;;  %v33_v18 = vld [vmem:[%s2010_s0 + $0x20] sm:$0xff]  ;;  %v34_v19 = vld [vmem:[%s2010_s0 + $0x28] sm:$0xff]  ;;  %v35_v20 = vld [vmem:[%s2010_s0 + $0x30] sm:$0xff]  ;;  %vm192_vm2 = vcmp.ge.s32.totalorder %v191_v46, 64  ;;  %vm193_vm3 = vcmp.lt.s32.totalorder %v191_v46, 96 }
   0x6   :  { %1549 = vmatprep.subr.bf16.mxu0 %v1548_v8  ;;  %1560 = vmatpush3.bf16.msra.mxu1 %v1762_v11  ;;  %v36_v21 = vld [vmem:[%s2010_s0 + $0x38] sm:$0xff]  ;;  %v1300_v22 = vld [vmem:[%s2012_s3] ss:$0 sm:$0xff]  ;;  %vm1833_vm4 = vmand %vm192_vm2, %vm193_vm3  ;;  %s1690_s3 = smov 64  }
   0x7   :  { %1561 = vmatprep.subr.bf16.mxu1 %v1687_v3  ;;  %v1044_v47 = vld [vmem:[%s2013_s4 + $0x10] sm:$0xff] }
   0x9   :  { %1551 = vmatpush3.bf16.msra.mxu0 %v1548_v8 }
   0xa   :  { %1552 = vmatprep.subr.bf16.mxu0 %v1687_v3  ;;  %1563 = vmatpush3.bf16.msra.mxu1 %v1772_v14 }
   0xb   :  { %1570 = vmatprep.subr.bf16.mxu1 %v1687_v3 }
   0xc   :  { %1414 = vmatmul.mubr.msk.f32.vlgmr.msra.gmra.mrb[0].mxu0 %vm48_vm0, %v30_v15 }
   0xd   :  { %1554 = vmatpush3.bf16.msra.mxu0 %v1762_v11  ;;  %1416 = vmatprep.mubr.msk.f32.mxu0 %vm48_vm0, %v31_v16 }
   0xe   :  { %1555 = vmatprep.subr.bf16.mxu0 %v1687_v3 }
  0x10   :  { %1417 = vmatmul.mubr.msk.f32.gmra.mrb[2].mxu0 %vm48_vm0, %v32_v17 }
  0x11   :  { %1419 = vmatprep.mubr.msk.f32.mxu0 %vm48_vm0, %v33_v18  ;;  %1557 = vmatpush3.bf16.msra.mxu0 %v1772_v14 }
  0x12   :  { %1564 = vmatprep.subr.bf16.mxu0 %v1687_v3 }
  0x14   :  { %1420 = vmatmul.mubr.msk.f32.gmra.mrb[4].mxu0 %vm48_vm0, %v34_v19 }
  0x15   :  { %1422 = vmatprep.mubr.msk.f32.mxu0 %vm48_vm0, %v35_v20 }
  0x18   :  { %1423 = vmatmul.mubr.msk.f32.gmra.mrb[6].mxu0 %vm48_vm0, %v36_v21 }
  0x19   :  { %1433 = vmatprep.mubr.msk.f32.mxu0 %vm1688_vm1, %v1689_v4 }
  0x1c   :  { %1434 = vmatmul.mubr.f32.vlgmr.msra.gmra.mrb[8].mxu0 %v1689_v4 }
  0x1d   :  { %1566 = vmatpush3.bf16.msra.mxu0 %v1762_v11  ;;  %1455 = vmatprep.mubr.msk.f32.mxu0 %vm1688_vm1, %v1689_v4 }
  0x1e   :  { %1567 = vmatprep.subr.bf16.mxu0 %v1687_v3 }
  0x21   :  { %1569 = vmatpush3.bf16.msra.mxu0 %v1772_v14 }
  0x22   :  { %1576 = vmatprep.subr.bf16.mxu0 %v1687_v3 }
  0xdf   :  { %v1415_v23 = vpop.f32.mrb[0].mxu0 }
  0xe0   :  { %v145_v24 = vadd.f32 %v1415_v23, %v1300_v22  ;;  %v139_v25 = vpop.f32.mrb[1].mxu0 }
  0xe1   :  { %v140_v38 = vadd.f32 %v1300_v22, %v139_v25 }
  0xe3   :  { %v1418_v26 = vpop.f32.mrb[2].mxu0 }
  0xe4   :  { %v1821_v27 = vadd.f32 %v1418_v26, %v1300_v22  ;;  %v149_v28 = vpop.f32.mrb[3].mxu0 }
  0xe5   :  { %v1823_v29 = vadd.f32 %v1300_v22, %v149_v28 }
  0xe7   :  { %v1421_v30 = vpop.f32.mrb[4].mxu0 }
  0xe8   :  { %v1825_v31 = vadd.f32 %v1421_v30, %v1300_v22  ;;  %v159_v32 = vpop.f32.mrb[5].mxu0 }
  0xe9   :  { %v1827_v33 = vadd.f32 %v1300_v22, %v159_v32 }
  0xeb   :  { %v1424_v34 = vpop.f32.mrb[6].mxu0 }
  0xec   :  { %v1829_v35 = vadd.f32 %v1424_v34, %v1300_v22  ;;  %v169_v36 = vpop.f32.mrb[7].mxu0 }
  0xed   :  { %v1831_v37 = vadd.f32 %v1300_v22, %v169_v36 }
  0xef   :  { %v265_v39 = vpop.f32.mrb[8].mxu0 }
  0xf0   :  { %v269_v40 = vadd.f32 %v265_v39, %v140_v38  ;;  %v1435_v41 = vpop.f32.mrb[9].mxu0 }
  0xf2   :  { %v1309_v42 = vmul.f32 -1.442695, %v269_v40 }
  0xf4   :  { %1619 = vpow2.f32 %v1309_v42 }
  0xf5   :  { %1621 = vtanh.f32 %v269_v40 }
  0xfe   :  { %v1620_v43 = vpop.eup %1619 }
  0xff   :  { %v274_v45 = vadd.f32 1.0, %v1620_v43  ;;  %v1622_v48 = vpop.eup %1621 }
 0x101   :  { %1623 = vrcp.f32 %v274_v45 }
 0x10b   :  { %v1624_v49 = vpop.eup %1623 }
 0x10c   :  { %v277_v50 = vsel %vm1833_vm4, %v1622_v48, %v1624_v49 }
 0x10d   :  { %280 = vrot.lane.b32.xlu0 %v277_v50, %s1690_s3  ;;  %v278_v53 = vmul.f32 0.0, %v277_v50 }
 0x17f   :  { %v281_v51 = vpop.permute.xlu0 %280 }
 0x180   :  { %v283_v52 = vmul.f32 %v281_v51, %v277_v50 }
 0x182   :  { %285 = vrot.lane.b32.xlu0 %v283_v52, %s1691_s14 }
 0x1f4   :  { %v286_v54 = vpop.permute.xlu0 %285 }
 0x1f5   :  { %v288_v55 = vadd.f32 %v286_v54, %v278_v53 }
 0x1f7   :  { %1625 = vtanh.f32 %v288_v55 }
 0x201   :  { %v1626_v56 = vpop.eup %1625 }
 0x202   :  { %291 = vrot.lane.b32.xlu1 %v1626_v56, %s1690_s3 }
 0x274   :  { %v292_v57 = vpop.permute.xlu1 %291 }
 0x275   :  { %v294_v58 = vmul.f32 %v292_v57, %v277_v50 }
 0x277   :  { %296 = vrot.lane.b32.xlu1 %v294_v58, %s1691_s14 }
 0x2e9   :  { %v297_v59 = vpop.permute.xlu1 %296 }
 0x2ea   :  { %299 = vst.msk [vmem:[#allocation3] sm:$0xff] %vm48_vm0, %v297_v59  ;;  %1445 = vmatmul.mubr.msk.f32.vlgmr.msra.gmra.mrb[0].mxu1 %vm48_vm0, %v297_v59 }
 0x2eb   :  { %1572 = vmatpush3.bf16.msra.mxu1 %v1762_v11  ;;  %1466 = vmatprep.mubr.msk.f32.mxu1 %vm1688_vm1, %v1689_v4 }
 0x2ec   :  { %1573 = vmatprep.subr.bf16.mxu1 %v1687_v3 }
 0x2ef   :  { %1575 = vmatpush3.bf16.msra.mxu1 %v1772_v14 }
 0x2f0   :  { %1582 = vmatprep.subr.bf16.mxu1 %v1687_v3 }
 0x3bd   :  { %v370_v60 = vpop.f32.mrb[0].mxu1 }
 0x3be   :  { %v374_v61 = vadd.f32 %v370_v60, %v145_v24  ;;  %v1446_v62 = vpop.f32.mrb[1].mxu1 }
 0x3c0   :  { %v1311_v63 = vmul.f32 -1.442695, %v374_v61 }
 0x3c2   :  { %1627 = vpow2.f32 %v1311_v63 }
 0x3c3   :  { %1629 = vtanh.f32 %v374_v61 }
 0x3cc   :  { %v1628_v0 = vpop.eup %1627 }
 0x3cd   :  { %v379_v1 = vadd.f32 1.0, %v1628_v0  ;;  %v1630_v2 = vpop.eup %1629 }
 0x3cf   :  { %1631 = vrcp.f32 %v379_v1 }
 0x3d9   :  { %v1632_v5 = vpop.eup %1631 }
 0x3da   :  { %v382_v6 = vsel %vm1833_vm4, %v1630_v2, %v1632_v5 }
 0x3db   :  { %385 = vrot.lane.b32.xlu0 %v382_v6, %s1690_s3  ;;  %v383_v9 = vmul.f32 %v382_v6, %v288_v55 }
 0x44d   :  { %v386_v7 = vpop.permute.xlu0 %385 }
 0x44e   :  { %v388_v8 = vmul.f32 %v386_v7, %v382_v6 }
 0x450   :  { %390 = vrot.lane.b32.xlu1 %v388_v8, %s1691_s14 }
 0x4c2   :  { %v391_v10 = vpop.permute.xlu1 %390 }
 0x4c3   :  { %v393_v12 = vadd.f32 %v391_v10, %v383_v9 }
 0x4c5   :  { %1633 = vtanh.f32 %v393_v12 }
 0x4cf   :  { %v1634_v13 = vpop.eup %1633 }
 0x4d0   :  { %396 = vrot.lane.b32.xlu0 %v1634_v13, %s1690_s3 }
 0x542   :  { %v397_v15 = vpop.permute.xlu0 %396 }
 0x543   :  { %v399_v16 = vmul.f32 %v397_v15, %v382_v6 }
 0x545   :  { %401 = vrot.lane.b32.xlu1 %v399_v16, %s1691_s14 }
 0x5b7   :  { %v402_v17 = vpop.permute.xlu1 %401 }
 0x5b8   :  { %405 = vst.msk [vmem:[#allocation3 + $0x8] sm:$0xff] %vm48_vm0, %v402_v17  ;;  %1456 = vmatmul.mubr.msk.f32.vlgmr.msra.gmra.mrb[10].mxu0 %vm48_vm0, %v402_v17 }
 0x5b9   :  { %1578 = vmatpush3.bf16.msra.mxu0 %v1762_v11  ;;  %1477 = vmatprep.mubr.msk.f32.mxu0 %vm1688_vm1, %v1689_v4 }
 0x5ba   :  { %1579 = vmatprep.subr.bf16.mxu0 %v1687_v3 }
 0x5bd   :  { %1581 = vmatpush3.bf16.msra.mxu0 %v1772_v14 }
 0x5be   :  { %1588 = vmatprep.subr.bf16.mxu0 %v1687_v3 }
 0x68b   :  { %v476_v18 = vpop.f32.mrb[10].mxu0 }
 0x68c   :  { %v480_v19 = vadd.f32 %v476_v18, %v1823_v29  ;;  %v1457_v20 = vpop.f32.mrb[11].mxu0 }
 0x68e   :  { %v1313_v21 = vmul.f32 -1.442695, %v480_v19 }
 0x690   :  { %1635 = vpow2.f32 %v1313_v21 }
 0x691   :  { %1637 = vtanh.f32 %v480_v19 }
 0x69a   :  { %v1636_v22 = vpop.eup %1635 }
 0x69b   :  { %v485_v23 = vadd.f32 1.0, %v1636_v22  ;;  %v1638_v24 = vpop.eup %1637 }
 0x69d   :  { %1639 = vrcp.f32 %v485_v23 }
 0x6a7   :  { %v1640_v25 = vpop.eup %1639 }
 0x6a8   :  { %v488_v26 = vsel %vm1833_vm4, %v1638_v24, %v1640_v25 }
 0x6a9   :  { %491 = vrot.lane.b32.xlu0 %v488_v26, %s1690_s3  ;;  %v489_v32 = vmul.f32 %v488_v26, %v393_v12 }
 0x71b   :  { %v492_v28 = vpop.permute.xlu0 %491 }
 0x71c   :  { %v494_v30 = vmul.f32 %v492_v28, %v488_v26 }
 0x71e   :  { %496 = vrot.lane.b32.xlu1 %v494_v30, %s1691_s14 }
 0x790   :  { %v497_v29 = vpop.permute.xlu1 %496 }
 0x791   :  { %v499_v34 = vadd.f32 %v497_v29, %v489_v32 }
 0x793   :  { %1641 = vtanh.f32 %v499_v34 }
 0x79d   :  { %v1642_v36 = vpop.eup %1641 }
 0x79e   :  { %502 = vrot.lane.b32.xlu0 %v1642_v36, %s1690_s3 }
 0x810   :  { %v503_v38 = vpop.permute.xlu0 %502 }
 0x811   :  { %v505_v39 = vmul.f32 %v503_v38, %v488_v26 }
 0x813   :  { %507 = vrot.lane.b32.xlu1 %v505_v39, %s1691_s14 }
 0x885   :  { %v508_v40 = vpop.permute.xlu1 %507 }
 0x886   :  { %511 = vst.msk [vmem:[#allocation3 + $0x10] sm:$0xff] %vm48_vm0, %v508_v40  ;;  %1467 = vmatmul.mubr.msk.f32.vlgmr.msra.gmra.mrb[2].mxu1 %vm48_vm0, %v508_v40 }
 0x887   :  { %1584 = vmatpush3.bf16.msra.mxu1 %v1762_v11  ;;  %1488 = vmatprep.mubr.msk.f32.mxu1 %vm1688_vm1, %v1689_v4 }
 0x888   :  { %1585 = vmatprep.subr.bf16.mxu1 %v1687_v3 }
 0x88b   :  { %1587 = vmatpush3.bf16.msra.mxu1 %v1772_v14 }
 0x88c   :  { %1594 = vmatprep.subr.bf16.mxu1 %v1687_v3 }
 0x959   :  { %v582_v41 = vpop.f32.mrb[2].mxu1 }
 0x95a   :  { %v586_v42 = vadd.f32 %v582_v41, %v1821_v27  ;;  %v1468_v43 = vpop.f32.mrb[3].mxu1 }
 0x95c   :  { %v1315_v44 = vmul.f32 -1.442695, %v586_v42 }
 0x95e   :  { %1643 = vpow2.f32 %v1315_v44 }
 0x95f   :  { %1645 = vtanh.f32 %v586_v42 }
 0x968   :  { %v1644_v45 = vpop.eup %1643 }
 0x969   :  { %v591_v46 = vadd.f32 1.0, %v1644_v45  ;;  %v1646_v48 = vpop.eup %1645 }
 0x96b   :  { %1647 = vrcp.f32 %v591_v46 }
 0x975   :  { %v1648_v49 = vpop.eup %1647 }
 0x976   :  { %v594_v50 = vsel %vm1833_vm4, %v1646_v48, %v1648_v49 }
 0x977   :  { %597 = vrot.lane.b32.xlu0 %v594_v50, %s1690_s3  ;;  %v595_v53 = vmul.f32 %v594_v50, %v499_v34 }
 0x9e9   :  { %v598_v51 = vpop.permute.xlu0 %597 }
 0x9ea   :  { %v600_v52 = vmul.f32 %v598_v51, %v594_v50 }
 0x9ec   :  { %602 = vrot.lane.b32.xlu1 %v600_v52, %s1691_s14 }
 0xa5e   :  { %v603_v27 = vpop.permute.xlu1 %602 }
 0xa5f   :  { %v605_v54 = vadd.f32 %v603_v27, %v595_v53 }
 0xa61   :  { %1649 = vtanh.f32 %v605_v54 }
 0xa6b   :  { %v1650_v55 = vpop.eup %1649 }
 0xa6c   :  { %608 = vrot.lane.b32.xlu0 %v1650_v55, %s1690_s3 }
 0xade   :  { %v609_v56 = vpop.permute.xlu0 %608 }
 0xadf   :  { %v611_v57 = vmul.f32 %v609_v56, %v594_v50 }
 0xae1   :  { %613 = vrot.lane.b32.xlu1 %v611_v57, %s1691_s14 }
 0xb53   :  { %v614_v58 = vpop.permute.xlu1 %613 }
 0xb54   :  { %617 = vst.msk [vmem:[#allocation3 + $0x18] sm:$0xff] %vm48_vm0, %v614_v58  ;;  %1478 = vmatmul.mubr.msk.f32.vlgmr.msra.gmra.mrb[12].mxu0 %vm48_vm0, %v614_v58 }
 0xb55   :  { %1590 = vmatpush3.bf16.msra.mxu0 %v1762_v11  ;;  %1499 = vmatprep.mubr.msk.f32.mxu0 %vm1688_vm1, %v1689_v4 }
 0xb56   :  { %1591 = vmatprep.subr.bf16.mxu0 %v1687_v3 }
 0xb59   :  { %1593 = vmatpush3.bf16.msra.mxu0 %v1772_v14 }
 0xb5a   :  { %1600 = vmatprep.subr.bf16.mxu0 %v1687_v3 }
 0xc27   :  { %v688_v59 = vpop.f32.mrb[12].mxu0 }
 0xc28   :  { %v692_v60 = vadd.f32 %v688_v59, %v1827_v33  ;;  %v1479_v61 = vpop.f32.mrb[13].mxu0 }
 0xc2a   :  { %v1317_v62 = vmul.f32 -1.442695, %v692_v60 }
 0xc2c   :  { %1651 = vpow2.f32 %v1317_v62 }
 0xc2d   :  { %1653 = vtanh.f32 %v692_v60 }
 0xc36   :  { %v1652_v63 = vpop.eup %1651 }
 0xc37   :  { %v697_v0 = vadd.f32 1.0, %v1652_v63  ;;  %v1654_v1 = vpop.eup %1653 }
 0xc39   :  { %1655 = vrcp.f32 %v697_v0 }
 0xc43   :  { %v1656_v2 = vpop.eup %1655 }
 0xc44   :  { %v700_v5 = vsel %vm1833_vm4, %v1654_v1, %v1656_v2  ;;  %v1042_v1 = vld [vmem:[%s2013_s4] sm:$0xff]  ;;  %v1043_v2 = vld [vmem:[%s2013_s4 + $0x8] sm:$0xff] }
 0xc45   :  { %703 = vrot.lane.b32.xlu0 %v700_v5, %s1690_s3  ;;  %v701_v8 = vmul.f32 %v700_v5, %v605_v54 }
 0xcb7   :  { %v704_v6 = vpop.permute.xlu0 %703 }
 0xcb8   :  { %v706_v7 = vmul.f32 %v704_v6, %v700_v5  ;;  %v1045_v6 = vld [vmem:[%s2013_s4 + $0x18] sm:$0xff] }
 0xcba   :  { %708 = vrot.lane.b32.xlu1 %v706_v7, %s1691_s14  ;;  %v1604_v7 = vpack.c.bf16 %v1045_v6, %v1044_v47 }
 0xd2c   :  { %v709_v33 = vpop.permute.xlu1 %708 }
 0xd2d   :  { %v711_v9 = vadd.f32 %v709_v33, %v701_v8 }
 0xd2f   :  { %1657 = vtanh.f32 %v711_v9 }
 0xd39   :  { %v1658_v10 = vpop.eup %1657 }
 0xd3a   :  { %714 = vrot.lane.b32.xlu0 %v1658_v10, %s1690_s3 }
 0xdac   :  { %v715_v12 = vpop.permute.xlu0 %714 }
 0xdad   :  { %v717_v13 = vmul.f32 %v715_v12, %v700_v5  ;;  %v1601_v5 = vpack.c.bf16 %v1043_v2, %v1042_v1  ;;  %v1148_v12 = vld [vmem:[%s2014_s6] sm:$0xff] }
 0xdaf   :  { %719 = vrot.lane.b32.xlu1 %v717_v13, %s1691_s14 }
 0xe21   :  { %v720_v15 = vpop.permute.xlu1 %719 }
 0xe22   :  { %723 = vst.msk [vmem:[#allocation3 + $0x20] sm:$0xff] %vm48_vm0, %v720_v15  ;;  %1489 = vmatmul.mubr.msk.f32.vlgmr.msra.gmra.mrb[4].mxu1 %vm48_vm0, %v720_v15  ;;  %v1150_v15 = vld [vmem:[%s2014_s6 + $0x10] sm:$0xff] }
 0xe23   :  { %1596 = vmatpush3.bf16.msra.mxu1 %v1762_v11  ;;  %1510 = vmatprep.mubr.msk.f32.mxu1 %vm1688_vm1, %v1689_v4 }
 0xe24   :  { %1597 = vmatprep.subr.bf16.mxu1 %v1687_v3 }
 0xe27   :  { %1599 = vmatpush3.bf16.msra.mxu1 %v1772_v14 }
 0xef5   :  { %v794_v16 = vpop.f32.mrb[4].mxu1 }
 0xef6   :  { %v798_v17 = vadd.f32 %v794_v16, %v1825_v31  ;;  %v1490_v18 = vpop.f32.mrb[5].mxu1  ;;  %v1151_v16 = vld [vmem:[%s2014_s6 + $0x18] sm:$0xff] }
 0xef7   :  { %v1324_v18 = vld [vmem:[%s2015_s5] ss:$0 sm:$0xff] }
 0xef8   :  { %v1319_v19 = vmul.f32 -1.442695, %v798_v17 }
 0xefa   :  { %1659 = vpow2.f32 %v1319_v19 }
 0xefb   :  { %1661 = vtanh.f32 %v798_v17  ;;  %v1610_v17 = vpack.c.bf16 %v1151_v16, %v1150_v15 }
 0xf04   :  { %v1660_v20 = vpop.eup %1659 }
 0xf05   :  { %v803_v21 = vadd.f32 1.0, %v1660_v20  ;;  %v1662_v22 = vpop.eup %1661 }
 0xf07   :  { %1663 = vrcp.f32 %v803_v21 }
 0xf11   :  { %v1664_v23 = vpop.eup %1663 }
 0xf12   :  { %v806_v11 = vsel %vm1833_vm4, %v1662_v22, %v1664_v23 }
 0xf13   :  { %809 = vrot.lane.b32.xlu0 %v806_v11, %s1690_s3  ;;  %v807_v14 = vmul.f32 %v806_v11, %v711_v9 }
 0xf85   :  { %v810_v24 = vpop.permute.xlu0 %809 }
 0xf86   :  { %v812_v25 = vmul.f32 %v810_v24, %v806_v11 }
 0xf88   :  { %814 = vrot.lane.b32.xlu1 %v812_v25, %s1691_s14 }
 0xffa   :  { %v815_v31 = vpop.permute.xlu1 %814 }
 0xffb   :  { %v817_v26 = vadd.f32 %v815_v31, %v807_v14  ;;  %v1132_v14 = vld [vmem:[#allocation3] sm:$0xff]  ;;  %v1133_v31 = vld [vmem:[#allocation3 + $0x8] sm:$0xff] }
 0xffd   :  { %1665 = vtanh.f32 %v817_v26 }
0x1007   :  { %v1666_v28 = vpop.eup %1665 }
0x1008   :  { %820 = vrot.lane.b32.xlu0 %v1666_v28, %s1690_s3 }
0x107a   :  { %v821_v30 = vpop.permute.xlu0 %820 }
0x107b   :  { %v823_v32 = vmul.f32 %v821_v30, %v806_v11  ;;  %v1134_v30 = vld [vmem:[#allocation3 + $0x10] sm:$0xff] }
0x107d   :  { %825 = vrot.lane.b32.xlu1 %v823_v32, %s1691_s14 }
0x10ef   :  { %v826_v29 = vpop.permute.xlu1 %825 }
0x10f0   :  { %829 = vst.msk [vmem:[#allocation3 + $0x28] sm:$0xff] %vm48_vm0, %v826_v29  ;;  %1500 = vmatmul.mubr.msk.f32.vlgmr.msra.gmra.mrb[14].mxu0 %vm48_vm0, %v826_v29  ;;  %v1135_v29 = vld [vmem:[#allocation3 + $0x18] sm:$0xff] }
0x10f1   :  { %1521 = vmatprep.mubr.msk.f32.mxu0 %vm1688_vm1, %v1689_v4  ;;  %1602 = vmatpush3.bf16.msra.mxu0 %v1601_v5 }
0x10f2   :  { %1603 = vmatprep.subr.bf16.mxu0 %v1687_v3  ;;  %v1149_v3 = vld [vmem:[%s2014_s6 + $0x8] sm:$0xff] }
0x10f3   :  { %v1606_v13 = vpack.c.bf16 %v1149_v3, %v1148_v12 }
0x10f5   :  { %1605 = vmatpush3.bf16.msra.mxu0 %v1604_v7  ;;  %1607 = vmatprep.subr.bf16.mxu1 %v1606_v13 }
0x11c3   :  { %v900_v34 = vpop.f32.mrb[14].mxu0 }
0x11c4   :  { %v904_v36 = vadd.f32 %v900_v34, %v1831_v37  ;;  %v1501_v38 = vpop.f32.mrb[15].mxu0 }
0x11c6   :  { %v1321_v39 = vmul.f32 -1.442695, %v904_v36 }
0x11c8   :  { %1667 = vpow2.f32 %v1321_v39  ;;  %v1137_v39 = vld [vmem:[#allocation3 + $0x28] sm:$0xff] }
0x11c9   :  { %1669 = vtanh.f32 %v904_v36  ;;  %v1136_v36 = vld [vmem:[#allocation3 + $0x20] sm:$0xff] }
0x11d2   :  { %v1668_v40 = vpop.eup %1667 }
0x11d3   :  { %v909_v41 = vadd.f32 1.0, %v1668_v40  ;;  %v1670_v42 = vpop.eup %1669 }
0x11d5   :  { %1671 = vrcp.f32 %v909_v41 }
0x11df   :  { %v1672_v43 = vpop.eup %1671 }
0x11e0   :  { %v912_v44 = vsel %vm1833_vm4, %v1670_v42, %v1672_v43 }
0x11e1   :  { %915 = vrot.lane.b32.xlu0 %v912_v44, %s1690_s3  ;;  %v913_v4 = vmul.f32 %v912_v44, %v817_v26 }
0x1253   :  { %v916_v45 = vpop.permute.xlu0 %915 }
0x1254   :  { %v918_v46 = vmul.f32 %v916_v45, %v912_v44  ;;  %v1327_v45 = vld [vmem:[%s2016_s7] ss:$0 sm:$0xff] }
0x1256   :  { %920 = vrot.lane.b32.xlu1 %v918_v46, %s1691_s14 }
0x12c8   :  { %v921_v37 = vpop.permute.xlu1 %920 }
0x12c9   :  { %v923_v48 = vadd.f32 %v921_v37, %v913_v4 }
0x12cb   :  { %1673 = vtanh.f32 %v923_v48 }
0x12d5   :  { %v1674_v49 = vpop.eup %1673 }
0x12d6   :  { %926 = vrot.lane.b32.xlu0 %v1674_v49, %s1690_s3 }
0x1348   :  { %v927_v50 = vpop.permute.xlu0 %926 }
0x1349   :  { %v929_v51 = vmul.f32 %v927_v50, %v912_v44 }
0x134b   :  { %931 = vrot.lane.b32.xlu1 %v929_v51, %s1691_s14 }
0x13bd   :  { %v932_v52 = vpop.permute.xlu1 %931 }
0x13be   :  { %935 = vst.msk [vmem:[#allocation3 + $0x30] sm:$0xff] %vm48_vm0, %v932_v52  ;;  %1511 = vmatmul.mubr.msk.f32.vlgmr.msra.gmra.mrb[6].mxu1 %vm48_vm0, %v932_v52 }
0x13bf   :  { %1609 = vmatpush3.bf16.msra.mxu1 %v1606_v13 }
0x13c0   :  { %1611 = vmatprep.subr.bf16.mxu1 %v1610_v17 }
0x13c3   :  { %1613 = vmatpush3.bf16.msra.mxu1 %v1610_v17 }
0x13c5   :  { %v1138_v41 = vld [vmem:[#allocation3 + $0x30] sm:$0xff] }
0x1491   :  { %v1006_v53 = vpop.f32.mrb[6].mxu1 }
0x1492   :  { %v1010_v27 = vadd.f32 %v1006_v53, %v1829_v35  ;;  %v1512_v54 = vpop.f32.mrb[7].mxu1 }
0x1494   :  { %v1323_v55 = vmul.f32 -1.442695, %v1010_v27 }
0x1496   :  { %1675 = vpow2.f32 %v1323_v55 }
0x1497   :  { %1677 = vtanh.f32 %v1010_v27 }
0x14a0   :  { %v1676_v56 = vpop.eup %1675 }
0x14a1   :  { %v1015_v57 = vadd.f32 1.0, %v1676_v56  ;;  %v1678_v58 = vpop.eup %1677 }
0x14a3   :  { %1679 = vrcp.f32 %v1015_v57 }
0x14ad   :  { %v1680_v59 = vpop.eup %1679 }
0x14ae   :  { %v1018_v60 = vsel %vm1833_vm4, %v1678_v58, %v1680_v59 }
0x14af   :  { %1021 = vrot.lane.b32.xlu0 %v1018_v60, %s1690_s3  ;;  %v1019_v63 = vmul.f32 %v1018_v60, %v923_v48 }
0x1521   :  { %v1022_v61 = vpop.permute.xlu0 %1021 }
0x1522   :  { %v1024_v62 = vmul.f32 %v1022_v61, %v1018_v60 }
0x1524   :  { %1026 = vrot.lane.b32.xlu1 %v1024_v62, %s1691_s14 }
0x1596   :  { %v1027_v35 = vpop.permute.xlu1 %1026 }
0x1597   :  { %v1029_v0 = vadd.f32 %v1027_v35, %v1019_v63 }
0x1599   :  { %1681 = vtanh.f32 %v1029_v0 }
0x15a3   :  { %v1682_v8 = vpop.eup %1681 }
0x15a4   :  { %1032 = vrot.lane.b32.xlu0 %v1682_v8, %s1690_s3 }
0x1616   :  { %v1033_v33 = vpop.permute.xlu0 %1032 }
0x1617   :  { %v1035_v9 = vmul.f32 %v1033_v33, %v1018_v60 }
0x1619   :  { %1037 = vrot.lane.b32.xlu1 %v1035_v9, %s1691_s14 }
0x168b   :  { %v1038_v10 = vpop.permute.xlu1 %1037 }
0x168c   :  { %1041 = vst.msk [vmem:[#allocation3 + $0x38] sm:$0xff] %vm48_vm0, %v1038_v10  ;;  %1522 = vmatmul.mubr.msk.f32.vlgmr.msra.gmra.mrb[16].mxu0 %vm48_vm0, %v1038_v10 }
0x1693   :  { %v1139_v43 = vld [vmem:[#allocation3 + $0x38] sm:$0xff] }
0x175f   :  { %v1121_v19 = vpop.f32.mrb[16].mxu0 }
0x1760   :  { %v1122_v20 = vadd.f32 %v1324_v18, %v1121_v19  ;;  %v1523_v21 = vpop.f32.mrb[17].mxu0 }
0x1762   :  { %v1326_v22 = vmul.f32 -1.442695, %v1122_v20 }
0x1764   :  { %1683 = vpow2.f32 %v1326_v22 }
0x176e   :  { %v1684_v23 = vpop.eup %1683 }
0x176f   :  { %v1128_v11 = vadd.f32 1.0, %v1684_v23 }
0x1771   :  { %1685 = vrcp.f32 %v1128_v11 }
0x177b   :  { %v1686_v24 = vpop.eup %1685 }
0x177c   :  { %v1131_v25 = vmul.f32 %v1686_v24, %v1122_v20 }
0x177e   :  { %v1140_v26 = vmul.f32 %v1132_v14, %v1131_v25  ;;  %v1141_v28 = vmul.f32 %v1133_v31, %v1131_v25  ;;  %v1142_v32 = vmul.f32 %v1134_v30, %v1131_v25  ;;  %v1143_v34 = vmul.f32 %v1135_v29, %v1131_v25 }
0x177f   :  { %v1144_v38 = vmul.f32 %v1136_v36, %v1131_v25  ;;  %v1145_v40 = vmul.f32 %v1137_v39, %v1131_v25  ;;  %v1146_v42 = vmul.f32 %v1138_v41, %v1131_v25  ;;  %v1147_v44 = vmul.f32 %v1139_v43, %v1131_v25 }
0x1780   :  { %1532 = vmatprep.mubr.msk.f32.mxu1 %vm48_vm0, %v1140_v26 }
0x1781   :  { %1533 = vmatmul.mubr.msk.f32.vlgmr.msra.gmra.mrb[8].mxu1 %vm48_vm0, %v1141_v28 }
0x1782   :  { %1535 = vmatprep.mubr.msk.f32.mxu1 %vm48_vm0, %v1142_v32 }
0x1785   :  { %1536 = vmatmul.mubr.msk.f32.gmra.mrb[10].mxu1 %vm48_vm0, %v1143_v34 }
0x1786   :  { %1538 = vmatprep.mubr.msk.f32.mxu1 %vm48_vm0, %v1144_v38 }
0x1789   :  { %1539 = vmatmul.mubr.msk.f32.gmra.mrb[12].mxu1 %vm48_vm0, %v1145_v40 }
0x178a   :  { %1541 = vmatprep.mubr.msk.f32.mxu1 %vm48_vm0, %v1146_v42 }
0x178d   :  { %1542 = vmatmul.mubr.msk.f32.gmra.mrb[14].mxu1 %vm48_vm0, %v1147_v44 }
0x1854   :  { %v1534_v46 = vpop.f32.mrb[8].mxu1 }
0x1855   :  { %v1255_v4 = vadd.f32 %v1534_v46, %v1327_v45  ;;  %v1249_v37 = vpop.f32.mrb[9].mxu1 }
0x1856   :  { %v1250_v48 = vadd.f32 %v1327_v45, %v1249_v37 }
0x1857   :  { %1289 = vst.msk [vmem:[%s2017_s8 + $0x8] sm:$0xff] %vm48_vm0, %v1255_v4 }
0x1858   :  { %1288 = vst.msk [vmem:[%s2017_s8] sm:$0xff] %vm48_vm0, %v1250_v48  ;;  %v1537_v49 = vpop.f32.mrb[10].mxu1 }
0x1859   :  { %v1265_v50 = vadd.f32 %v1537_v49, %v1327_v45  ;;  %v1259_v51 = vpop.f32.mrb[11].mxu1 }
0x185a   :  { %v1260_v52 = vadd.f32 %v1327_v45, %v1259_v51 }
0x185b   :  { %1291 = vst.msk [vmem:[%s2017_s8 + $0x18] sm:$0xff] %vm48_vm0, %v1265_v50 }
0x185c   :  { %1290 = vst.msk [vmem:[%s2017_s8 + $0x10] sm:$0xff] %vm48_vm0, %v1260_v52  ;;  %v1540_v53 = vpop.f32.mrb[12].mxu1 }
0x185d   :  { %v1275_v27 = vadd.f32 %v1540_v53, %v1327_v45  ;;  %v1269_v54 = vpop.f32.mrb[13].mxu1 }
0x185e   :  { %v1270_v55 = vadd.f32 %v1327_v45, %v1269_v54 }
0x185f   :  { %1293 = vst.msk [vmem:[%s2017_s8 + $0x28] sm:$0xff] %vm48_vm0, %v1275_v27 }
0x1860   :  { %1292 = vst.msk [vmem:[%s2017_s8 + $0x20] sm:$0xff] %vm48_vm0, %v1270_v55  ;;  %v1543_v56 = vpop.f32.mrb[14].mxu1 }
0x1861   :  { %v1285_v57 = vadd.f32 %v1543_v56, %v1327_v45  ;;  %v1279_v58 = vpop.f32.mrb[15].mxu1 }
0x1862   :  { %v1280_v59 = vadd.f32 %v1327_v45, %v1279_v58 }
0x1863   :  { %1295 = vst.msk [vmem:[%s2017_s8 + $0x38] sm:$0xff] %vm48_vm0, %v1285_v57 }
0x1864   :  { %1294 = vst.msk [vmem:[%s2017_s8 + $0x30] sm:$0xff] %vm48_vm0, %v1280_v59 }

</bundles_post_ra>
